<compile_context>
chip_gen: v7x
topology: tpu7x:2x2x1
jax: 0.10.0
libtpu: 0.0.40
codegen_flags: <defaults>
</compile_context>

<pallas_src>
import functools

import jax
import jax.numpy as jnp
import numpy as np
from jax import lax
from jax.experimental import pallas as pl
from jax.experimental.pallas import tpu as pltpu


def _round_up(x, m):
    return (x + m - 1) // m * m


def _largest_divisor_tile(total, candidates=(512, 256, 128)):
    for c in candidates:
        if total % c == 0:
            return c
    return total


# ----------------------------- Kernel 1: MLP ---------------------------------
def _dpb_mlp_kernel(w1_ref, b1_ref, w2_ref, b2_ref, w3_ref, b3_ref, out_ref,
                    *, j_total, tile_q, log_distance):
    # Weights are in PyTorch (out_features, in_features) layout, zero-padded to D_PAD.
    #   w1: (D_PAD, 1)  b1: (D_PAD, 1)   w2: (D_PAD, D_PAD)  b2: (D_PAD, 1)
    #   w3: (H, D_PAD)  b3: (H, 1)       out: (H, TILE_Q)
    t = pl.program_id(0)
    # Global lane index m of this tile; column m holds MLP(pos = (J-1) - m),
    # i.e. the position axis is emitted reversed for kernel 2's ascending windows.
    m = lax.broadcasted_iota(jnp.int32, (1, tile_q), 1) + t * tile_q
    pos = ((j_total - 1) - m).astype(jnp.float32)            # (1, TILE_Q)
    if log_distance:
        pos = jnp.sign(pos) * jnp.log(jnp.abs(pos) + 1.0)

    # Linear(1, D) + SiLU — K == 1, so a VPU outer product (no degenerate matmul).
    a = w1_ref[...] * pos + b1_ref[...]                      # (D_PAD, TILE_Q)
    a = a * jax.nn.sigmoid(a)

    # Linear(D, D) + SiLU — MXU, lane-dense operands.
    a = jnp.dot(w2_ref[...], a, preferred_element_type=jnp.float32) + b2_ref[...]
    a = a * jax.nn.sigmoid(a)

    # Linear(D, heads) head — result already in lane-dense (H, TILE_Q) layout.
    out_ref[...] = (jnp.dot(w3_ref[...], a, preferred_element_type=jnp.float32)
                    + b3_ref[...])


def _run_mlp(padded_params, j_total, q_pad, log_distance):
    w1, b1, w2, b2, w3, b3 = padded_params
    heads = w3.shape[0]
    tile_q = _largest_divisor_tile(q_pad)
    grid = (q_pad // tile_q,)

    kern = functools.partial(_dpb_mlp_kernel, j_total=j_total, tile_q=tile_q,
                             log_distance=log_distance)
    params = (w1, b1, w2, b2, w3, b3)
    in_specs = [pl.BlockSpec(p.shape, lambda t: (0, 0)) for p in params]
    return pl.pallas_call(
        kern,
        out_shape=jax.ShapeDtypeStruct((heads, q_pad), jnp.float32),
        grid=grid,
        in_specs=in_specs,
        out_specs=pl.BlockSpec((heads, tile_q), lambda t: (0, t)),
        compiler_params=pltpu.CompilerParams(
            dimension_semantics=("parallel",)),
    )(*params)


# ---------------- Kernel 2: fused Toeplitz gather + rearrange + pad ----------
def _dpb_bias_kernel(u_ref, out_ref, *, j_total, q_pad, tile_i, num_mem):
    # u_ref:   (1, 1, Q_PAD)   — this head's MLP row, u[m] = MLP(J-1-m)
    # out_ref: (1, TILE_I, J)  — rows [r0, r0+TILE_I) of bias[head]
    r0 = pl.program_id(1) * tile_i
    u = u_ref[0]                                              # (1, Q_PAD)

    # Hoisted out of the row loop (broadcasts are not CSE'd by JAX).
    col_ok = lax.broadcasted_iota(jnp.int32, (1, j_total), 1) >= num_mem

    # Zero-init covers the num_mem pad rows and any ragged tail of the last tile.
    out_ref[...] = jnp.zeros_like(out_ref)

    def row_body(a, carry):
        gr = r0 + a                                           # global output row
        # bias[gr, c] = u[(J-1-gr) + c]  -> rotate so that lane c holds u[J-1-gr+c].
        shift = jnp.remainder(gr + (q_pad - (j_total - 1)), q_pad)
        rolled = pltpu.roll(u, shift, axis=1)                 # (1, Q_PAD)
        row = rolled[:, :j_total]                             # (1, J)
        row = jnp.where(col_ok & (gr >= num_mem), row, 0.0)
        out_ref[0, pl.ds(a, 1), :] = row
        return carry

    n_rows = jnp.minimum(tile_i, j_total - r0)                # handle partial tile
    lax.fori_loop(0, n_rows, row_body, 0)


def _run_bias_expand(u3, j_total, num_mem):
    heads, _, q_pad = u3.shape
    if j_total <= 1024:
        tile_i = j_total
    else:
        # Keep double-buffered output blocks a few MiB (v7x has only 64 MiB VMEM).
        tile_i = max(8, min(256, ((1 << 20) // j_total) // 8 * 8))
    grid = (heads, pl.cdiv(j_total, tile_i))

    kern = functools.partial(_dpb_bias_kernel, j_total=j_total, q_pad=q_pad,
                             tile_i=tile_i, num_mem=num_mem)
    return pl.pallas_call(
        kern,
        out_shape=jax.ShapeDtypeStruct((heads, j_total, j_total), jnp.float32),
        grid=grid,
        in_specs=[pl.BlockSpec((1, 1, q_pad), lambda h, t: (h, 0, 0))],
        out_specs=pl.BlockSpec((1, tile_i, j_total), lambda h, t: (h, t, 0)),
        compiler_params=pltpu.CompilerParams(
            dimension_semantics=("parallel", "parallel")),
    )(u3)


# ----------------------------- Module wrapper --------------------------------
def init_dynamic_position_bias_params(key, dim, heads):
    """Synthetic params for DynamicPositionBias(dim, heads, depth=2, norm=False),
    in PyTorch (out_features, in_features) layout."""
    k1, k2, k3, k4, k5, k6 = jax.random.split(key, 6)
    w1 = jax.random.normal(k1, (dim, 1), jnp.float32) * 0.5
    b1 = jax.random.normal(k2, (dim,), jnp.float32) * 0.1
    w2 = jax.random.normal(k3, (dim, dim), jnp.float32) * (1.0 / np.sqrt(dim))
    b2 = jax.random.normal(k4, (dim,), jnp.float32) * 0.1
    w3 = jax.random.normal(k5, (heads, dim), jnp.float32) * (1.0 / np.sqrt(dim))
    b3 = jax.random.normal(k6, (heads,), jnp.float32) * 0.1
    return (w1, b1, w2, b2, w3, b3)


def pad_params_for_kernel(params):
    """Zero-pad the hidden dim to a multiple of 128 (exact: SiLU(0)=0, padded
    rows/cols contribute nothing), and reshape biases to column vectors."""
    w1, b1, w2, b2, w3, b3 = params
    dim = w1.shape[0]
    heads = w3.shape[0]
    d_pad = max(128, _round_up(dim, 128))
    pd = d_pad - dim
    w1p = jnp.pad(w1, ((0, pd), (0, 0)))
    b1p = jnp.pad(b1, ((0, pd),)).reshape(d_pad, 1)
    w2p = jnp.pad(w2, ((0, pd), (0, pd)))
    b2p = jnp.pad(b2, ((0, pd),)).reshape(d_pad, 1)
    w3p = jnp.pad(w3, ((0, 0), (0, pd)))
    b3p = b3.reshape(heads, 1)
    return (w1p, b1p, w2p, b2p, w3p, b3p)


def dynamic_position_bias_forward(padded_params, i, j, *, num_mem=1,
                                  log_distance=False):
    """Mirrors DynamicPositionBias.forward(i, j) with depth=2, norm=False."""
    assert i == j
    n = j - num_mem
    assert n >= 1
    j_total = j
    q_pad = _round_up(2 * j_total - 1, 128)

    # Kernel 1: lane-dense (heads, Q_pad) MLP table, positions generated in-kernel.
    u = _run_mlp(padded_params, j_total, q_pad, log_distance)
    heads = u.shape[0]
    # Free metadata reshape so kernel 2's block satisfies the (8,128) rule cleanly.
    u3 = u.reshape(heads, 1, q_pad)

    # Kernel 2: fused Toeplitz gather + (i j h)->(h i j) + mem-token zero pad.
    return _run_bias_expand(u3, j_total, num_mem)             # (heads, j, j)


# ----------------------- Pure-JAX reference (sanity) --------------------------
def _reference_forward(params, i, j, *, num_mem=1, log_distance=False):
    assert i == j
    w1, b1, w2, b2, w3, b3 = params
    n = j - num_mem
    pos = jnp.arange(-n + 1, n, dtype=jnp.float32)[:, None]
    if log_distance:
        pos = jnp.sign(pos) * jnp.log(jnp.abs(pos) + 1.0)
    h = jnp.matmul(pos, w1.T, precision="highest") + b1
    h = h * jax.nn.sigmoid(h)
    h = jnp.matmul(h, w2.T, precision="highest") + b2
    h = h * jax.nn.sigmoid(h)
    out = jnp.matmul(h, w3.T, precision="highest") + b3       # (2n-1, heads)
    seq = jnp.arange(n)
    idx = seq[:, None] - seq[None, :] + (n - 1)
    bias = jnp.transpose(out[idx], (2, 0, 1))                 # (heads, n, n)
    return jnp.pad(bias, ((0, 0), (num_mem, 0), (num_mem, 0)))


if __name__ == "__main__":
    # Small config consistent with the module:
    #   dim=32, heads=4, depth=2, num_mem=1, i=j=9  => n=8, 2n-1=15 positions.
    dim, heads, num_mem = 32, 4, 1
    i = j = 9

    key = jax.random.PRNGKey(0)
    params = init_dynamic_position_bias_params(key, dim, heads)
    padded = pad_params_for_kernel(params)

    bias = dynamic_position_bias_forward(padded, i, j, num_mem=num_mem)
    bias = jax.block_until_ready(bias)

    ref = _reference_forward(params, i, j, num_mem=num_mem)
    ref = jax.block_until_ready(ref)

    assert bias.shape == (heads, j, j)
    np.testing.assert_allclose(np.asarray(bias), np.asarray(ref),
                               rtol=1e-4, atol=1e-4)

    print("KERNEL_OK")
</pallas_src>

<mosaic_0001>
module attributes {stable_mosaic.version = 11 : i64} {
  func.func @_dpb_mlp_kernel(%arg0: i32, %arg1: memref<128x1xf32, #tpu.memory_space<vmem>>, %arg2: memref<128x1xf32, #tpu.memory_space<vmem>>, %arg3: memref<128x128xf32, #tpu.memory_space<vmem>>, %arg4: memref<128x1xf32, #tpu.memory_space<vmem>>, %arg5: memref<4x128xf32, #tpu.memory_space<vmem>>, %arg6: memref<4x1xf32, #tpu.memory_space<vmem>>, %arg7: memref<4x128xf32, #tpu.memory_space<vmem>>) attributes {dimension_semantics = [#tpu.dimension_semantics<parallel>], iteration_bounds = array<i64: 1>, scalar_prefetch = 0 : i64, scratch_operands = 0 : i64, tpu.core_type = #tpu.core_type<tc>, window_params = [{pipeline_mode = #tpu.pipeline_mode<synchronous>, transform_indices = @transform_0, window_bounds = array<i64: 128, 1>}, {pipeline_mode = #tpu.pipeline_mode<synchronous>, transform_indices = @transform_1, window_bounds = array<i64: 128, 1>}, {pipeline_mode = #tpu.pipeline_mode<synchronous>, transform_indices = @transform_2, window_bounds = array<i64: 128, 128>}, {pipeline_mode = #tpu.pipeline_mode<synchronous>, transform_indices = @transform_3, window_bounds = array<i64: 128, 1>}, {pipeline_mode = #tpu.pipeline_mode<synchronous>, transform_indices = @transform_4, window_bounds = array<i64: 4, 128>}, {pipeline_mode = #tpu.pipeline_mode<synchronous>, transform_indices = @transform_5, window_bounds = array<i64: 4, 1>}, {transform_indices = @transform_6, window_bounds = array<i64: 4, 128>}]} {
    %0 = tpu.iota {dimensions = array<i32: 1>} : vector<1x128xi32>
    %c128_i32 = arith.constant 128 : i32
    %1 = arith.muli %arg0, %c128_i32 : i32
    %2 = vector.broadcast %1 : i32 to vector<1x128xi32>
    %3 = arith.addi %0, %2 : vector<1x128xi32>
    %c8_i32 = arith.constant 8 : i32
    %4 = vector.broadcast %c8_i32 : i32 to vector<1x128xi32>
    %5 = arith.subi %4, %3 : vector<1x128xi32>
    %6 = arith.sitofp %5 : vector<1x128xi32> to vector<1x128xf32>
    %c0 = arith.constant 0 : index
    %c0_0 = arith.constant 0 : index
    %7 = vector.load %arg1[%c0, %c0_0] : memref<128x1xf32, #tpu.memory_space<vmem>>, vector<128x1xf32>
    %8 = vector.broadcast %7 : vector<128x1xf32> to vector<128x128xf32>
    %9 = vector.broadcast %6 : vector<1x128xf32> to vector<128x128xf32>
    %10 = arith.mulf %8, %9 : vector<128x128xf32>
    %c0_1 = arith.constant 0 : index
    %c0_2 = arith.constant 0 : index
    %11 = vector.load %arg2[%c0_1, %c0_2] : memref<128x1xf32, #tpu.memory_space<vmem>>, vector<128x1xf32>
    %12 = vector.broadcast %11 : vector<128x1xf32> to vector<128x128xf32>
    %13 = arith.addf %10, %12 : vector<128x128xf32>
    %14 = arith.negf %13 : vector<128x128xf32>
    %15 = math.exp %14 : vector<128x128xf32>
    %cst = arith.constant 1.000000e+00 : f32
    %16 = vector.broadcast %cst : f32 to vector<128x128xf32>
    %17 = arith.addf %16, %15 : vector<128x128xf32>
    %18 = arith.divf %16, %17 : vector<128x128xf32>
    %19 = arith.mulf %13, %18 : vector<128x128xf32>
    %c0_3 = arith.constant 0 : index
    %c0_4 = arith.constant 0 : index
    %20 = vector.load %arg3[%c0_3, %c0_4] : memref<128x128xf32, #tpu.memory_space<vmem>>, vector<128x128xf32>
    %cst_5 = arith.constant dense<0.000000e+00> : vector<128x128xf32>
    %21 = tpu.matmul %20, %19, %cst_5 {dimension_numbers = #tpu.dot_dimension_numbers<[1], [0], [0], [1], [0, 0, 1, 1], [], []>} : vector<128x128xf32>, vector<128x128xf32>, vector<128x128xf32> -> vector<128x128xf32>
    %c0_6 = arith.constant 0 : index
    %c0_7 = arith.constant 0 : index
    %22 = vector.load %arg4[%c0_6, %c0_7] : memref<128x1xf32, #tpu.memory_space<vmem>>, vector<128x1xf32>
    %23 = vector.broadcast %22 : vector<128x1xf32> to vector<128x128xf32>
    %24 = arith.addf %21, %23 : vector<128x128xf32>
    %25 = arith.negf %24 : vector<128x128xf32>
    %26 = math.exp %25 : vector<128x128xf32>
    %cst_8 = arith.constant 1.000000e+00 : f32
    %27 = vector.broadcast %cst_8 : f32 to vector<128x128xf32>
    %28 = arith.addf %27, %26 : vector<128x128xf32>
    %29 = arith.divf %27, %28 : vector<128x128xf32>
    %30 = arith.mulf %24, %29 : vector<128x128xf32>
    %c0_9 = arith.constant 0 : index
    %c0_10 = arith.constant 0 : index
    %31 = vector.load %arg5[%c0_9, %c0_10] : memref<4x128xf32, #tpu.memory_space<vmem>>, vector<4x128xf32>
    %cst_11 = arith.constant dense<0.000000e+00> : vector<4x128xf32>
    %32 = tpu.matmul %31, %30, %cst_11 {dimension_numbers = #tpu.dot_dimension_numbers<[1], [0], [0], [1], [0, 0, 1, 1], [], []>} : vector<4x128xf32>, vector<128x128xf32>, vector<4x128xf32> -> vector<4x128xf32>
    %c0_12 = arith.constant 0 : index
    %c0_13 = arith.constant 0 : index
    %33 = vector.load %arg6[%c0_12, %c0_13] : memref<4x1xf32, #tpu.memory_space<vmem>>, vector<4x1xf32>
    %34 = vector.broadcast %33 : vector<4x1xf32> to vector<4x128xf32>
    %35 = arith.addf %32, %34 : vector<4x128xf32>
    %c0_14 = arith.constant 0 : index
    %c0_15 = arith.constant 0 : index
    %36 = vector.load %arg7[%c0_14, %c0_15] : memref<4x128xf32, #tpu.memory_space<vmem>>, vector<4x128xf32>
    tpu.vector_store %arg7[%c0_14, %c0_15], %35 {strides = array<i32>} : memref<4x128xf32, #tpu.memory_space<vmem>>, vector<4x128xf32>,
    return
  }
  func.func @transform_0(%arg0: i32) -> (i32, i32) {
    %c0_i32 = arith.constant 0 : i32
    %c0_i32_0 = arith.constant 0 : i32
    %c0_i32_1 = arith.constant 0 : i32
    return %c0_i32, %c0_i32_0 : i32, i32
  }
  func.func @transform_1(%arg0: i32) -> (i32, i32) {
    %c0_i32 = arith.constant 0 : i32
    %c0_i32_0 = arith.constant 0 : i32
    %c0_i32_1 = arith.constant 0 : i32
    return %c0_i32, %c0_i32_0 : i32, i32
  }
  func.func @transform_2(%arg0: i32) -> (i32, i32) {
    %c0_i32 = arith.constant 0 : i32
    %c0_i32_0 = arith.constant 0 : i32
    %c0_i32_1 = arith.constant 0 : i32
    return %c0_i32, %c0_i32_0 : i32, i32
  }
  func.func @transform_3(%arg0: i32) -> (i32, i32) {
    %c0_i32 = arith.constant 0 : i32
    %c0_i32_0 = arith.constant 0 : i32
    %c0_i32_1 = arith.constant 0 : i32
    return %c0_i32, %c0_i32_0 : i32, i32
  }
  func.func @transform_4(%arg0: i32) -> (i32, i32) {
    %c0_i32 = arith.constant 0 : i32
    %c0_i32_0 = arith.constant 0 : i32
    %c0_i32_1 = arith.constant 0 : i32
    return %c0_i32, %c0_i32_0 : i32, i32
  }
  func.func @transform_5(%arg0: i32) -> (i32, i32) {
    %c0_i32 = arith.constant 0 : i32
    %c0_i32_0 = arith.constant 0 : i32
    %c0_i32_1 = arith.constant 0 : i32
    return %c0_i32, %c0_i32_0 : i32, i32
  }
  func.func @transform_6(%arg0: i32) -> (i32, i32) {
    %c0_i32 = arith.constant 0 : i32
    %c0_i32_0 = arith.constant 0 : i32
    return %c0_i32, %arg0 : i32, i32
  }
}

</mosaic_0001>

<bundles_post_ra>
// kernel: tpu_custom_call.1
= control target key start
LH: loop header
LB: loop body
LE: loop exit
PB: predicated region body
PF: predicated region fallthrough
CT: control target
= control target key end

     0   :  { %v1215_v2 = vmov 0   ;;  %s1607_s0 = inlined_call_operand.vmem [shape: f32[128,1], index: 0, kind: input, shape index: {}]   ;;  %s1608_s1 = inlined_call_operand.vmem [shape: f32[128,1], index: 1, kind: input, shape index: {}]   ;;  %s1609_s2 = inlined_call_operand.vmem [shape: f32[128,128], index: 2, kind: input, shape index: {}]   ;;  %s1610_s3 = inlined_call_operand.vmem [shape: f32[128,1], index: 3, kind: input, shape index: {}]   ;;  %s1611_s4 = inlined_call_operand.vmem [shape: f32[4,128], index: 4, kind: input, shape index: {}]   ;;  %s1612_s5 = inlined_call_operand.vmem [shape: f32[4,1], index: 5, kind: input, shape index: {}]   ;;  %s1613_s6 = inlined_call_operand.hbm [shape: f32[4,128], index: 6, kind: output, shape index: {}]  }
   0x1   :  { %v143_v0 = vld [vmem:[%s1608_s1] sm:$0xff]  ;;  %1062 = vset.pattern.permute.xlu1 %v1215_v2  ;;  %1061 = vset.pattern.permute.xlu0 %v1215_v2  ;;  %v144_v3 = vld [vmem:[%s1608_s1 + $0x8] sm:$0xff]  ;;  %v34_v5 = vld [vmem:[%s1607_s0 + $0x18] sm:$0xff] }
   0x2   :  { %v31_v1 = vld [vmem:[%s1607_s0] sm:$0xff]  ;;  %161 = vperm.xlu1 %1062, %v143_v0   ;;  %v32_v4 = vld [vmem:[%s1607_s0 + $0x8] sm:$0xff]  ;;  %v33_v6 = vld [vmem:[%s1607_s0 + $0x10] sm:$0xff] }
   0x3   :  { %49 = vperm.xlu0 %1061, %v31_v1   ;;  %v146_v7 = vld [vmem:[%s1608_s1 + $0x18] sm:$0xff]  ;;  %v145_v8 = vld [vmem:[%s1608_s1 + $0x10] sm:$0xff]  ;;  %v36_v9 = vld [vmem:[%s1607_s0 + $0x28] sm:$0xff] }
   0x4   :  { %v35_v10 = vld [vmem:[%s1607_s0 + $0x20] sm:$0xff] }
   0x6   :  { %166 = vperm.xlu1 %1062, %v144_v3  }
   0x7   :  { %54 = vperm.xlu0 %1061, %v32_v4  }
   0xa   :  { %64 = vperm.xlu1 %1062, %v34_v5  }
   0xb   :  { %59 = vperm.xlu0 %1061, %v33_v6  }
   0xe   :  { %176 = vperm.xlu1 %1062, %v146_v7  }
   0xf   :  { %171 = vperm.xlu0 %1061, %v145_v8  }
  0x10   :  { %11 = vsyncpa [#allocation3], 0  ;;  %v148_v11 = vld [vmem:[%s1608_s1 + $0x28] sm:$0xff]  ;;  %v147_v12 = vld [vmem:[%s1608_s1 + $0x20] sm:$0xff]  ;;  %v24_v51 = vlaneseq  ;;  %vm1217_vm0 = vmmov 0   ;;  %s1219_s22 = smov [#allocation2]  }
  0x11   :  { %v38_v13 = vld [vmem:[%s1607_s0 + $0x38] sm:$0xff]  ;;  %v37_v14 = vld [vmem:[%s1607_s0 + $0x30] sm:$0xff]  ;;  %v40_v17 = vld [vmem:[%s1607_s0 + $0x48] sm:$0xff]  ;;  %s820_s23 = sshll.u32 %s1219_s22, 4  ;;  %s821_s23 = int_to_ptr.vmem [resolvable:$true] %s820_s23 }
  0x12   :  { %74 = vperm.xlu1 %1062, %v36_v9   ;;  %v150_v15 = vld [vmem:[%s1608_s1 + $0x38] sm:$0xff]  ;;  %v149_v16 = vld [vmem:[%s1608_s1 + $0x30] sm:$0xff]  ;;  %v39_v18 = vld [vmem:[%s1607_s0 + $0x40] sm:$0xff]  ;;  %v25_v52 = vand.u32 127, %v24_v51  ;;  %s1191_s24 = scalar_lea.vmem %s821_s23, 64  ;;  %p1196_p1 = scmp.lt.s32.totalorder %s821_s23, %s821_s23 }
  0x13   :  { %69 = vperm.xlu0 %1061, %v35_v10   ;;  %v152_v19 = vld [vmem:[%s1608_s1 + $0x48] sm:$0xff]  ;;  %v151_v20 = vld [vmem:[%s1608_s1 + $0x40] sm:$0xff]  ;;  %v42_v21 = vld [vmem:[%s1607_s0 + $0x58] sm:$0xff]  ;;  %p1192_p0 = scmp.ne.s32.totalorder %s821_s23, %s1191_s24  ;;  %p1197_p2 = scmp.lt.s32.totalorder %s1191_s24, %s1191_s24 }
  0x14   :  { %v41_v22 = vld [vmem:[%s1607_s0 + $0x50] sm:$0xff]  ;;  %v154_v23 = vld [vmem:[%s1608_s1 + $0x58] sm:$0xff]  ;;  %v44_v25 = vld [vmem:[%s1607_s0 + $0x68] sm:$0xff]  ;;  %v29_v53 = vsub.s32 8, %v25_v52 }
  0x15   :  { %v153_v24 = vld [vmem:[%s1608_s1 + $0x50] sm:$0xff]  ;;  %v43_v26 = vld [vmem:[%s1607_s0 + $0x60] sm:$0xff]  ;;  %v156_v27 = vld [vmem:[%s1608_s1 + $0x68] sm:$0xff]  ;;  %p1198_p3 = por %p1197_p2, %p1196_p1 }
  0x16   :  { %186 = vperm.xlu1 %1062, %v148_v11   ;;  %v155_v28 = vld [vmem:[%s1608_s1 + $0x60] sm:$0xff]  ;;  %v46_v29 = vld [vmem:[%s1607_s0 + $0x78] sm:$0xff]  ;;  %v45_v30 = vld [vmem:[%s1607_s0 + $0x70] sm:$0xff]  ;;  %v1405_v54 = vcvt.s32.f32 %v29_v53 }
  0x17   :  { %181 = vperm.xlu0 %1061, %v147_v12   ;;  %v158_v31 = vld [vmem:[%s1608_s1 + $0x78] sm:$0xff]  ;;  %v157_v32 = vld [vmem:[%s1608_s1 + $0x70] sm:$0xff]  ;;  %v384_v33 = vld [vmem:[%s1610_s3 + $0x8] sm:$0xff]  ;;  %p1199_p4 = pnand %p1198_p3, %p1192_p0 }
  0x18   :  { %v383_v34 = vld [vmem:[%s1610_s3] sm:$0xff]  ;;  %v386_v35 = vld [vmem:[%s1610_s3 + $0x18] sm:$0xff]  ;;  %v385_v36 = vld [vmem:[%s1610_s3 + $0x10] sm:$0xff] }
  0x19   :  { %v388_v37 = vld [vmem:[%s1610_s3 + $0x28] sm:$0xff]  ;;  %v387_v38 = vld [vmem:[%s1610_s3 + $0x20] sm:$0xff]  ;;  %v390_v39 = vld [vmem:[%s1610_s3 + $0x38] sm:$0xff] }
  0x1a   :  { %84 = vperm.xlu1 %1062, %v38_v13   ;;  %v389_v40 = vld [vmem:[%s1610_s3 + $0x30] sm:$0xff]  ;;  %v392_v41 = vld [vmem:[%s1610_s3 + $0x48] sm:$0xff]  ;;  %v391_v42 = vld [vmem:[%s1610_s3 + $0x40] sm:$0xff] }
  0x1b   :  { %79 = vperm.xlu0 %1061, %v37_v14   ;;  %v394_v43 = vld [vmem:[%s1610_s3 + $0x58] sm:$0xff]  ;;  %v393_v44 = vld [vmem:[%s1610_s3 + $0x50] sm:$0xff]  ;;  %v396_v45 = vld [vmem:[%s1610_s3 + $0x68] sm:$0xff] }
  0x1c   :  { %v395_v46 = vld [vmem:[%s1610_s3 + $0x60] sm:$0xff]  ;;  %v398_v47 = vld [vmem:[%s1610_s3 + $0x78] sm:$0xff]  ;;  %v397_v48 = vld [vmem:[%s1610_s3 + $0x70] sm:$0xff] }
  0x1d   :  { %v737_v49 = vld [vmem:[%s1612_s5] sm:$0xf] }
  0x1e   :  { %196 = vperm.xlu1 %1062, %v150_v15   ;;  %v367_v50 = vld [vmem:[%s1609_s2] sm:$0xff] }
  0x1f   :  { %191 = vperm.xlu0 %1061, %v149_v16   ;;  %941 = vmatprep.mubr.f32.mxu0 %v367_v50 }
  0x22   :  { %94 = vperm.xlu1 %1062, %v40_v17  }
  0x23   :  { %89 = vperm.xlu0 %1061, %v39_v18  }
  0x26   :  { %206 = vperm.xlu1 %1062, %v152_v19  }
  0x27   :  { %201 = vperm.xlu0 %1061, %v151_v20  }
  0x2a   :  { %104 = vperm.xlu1 %1062, %v42_v21  }
  0x2b   :  { %99 = vperm.xlu0 %1061, %v41_v22  }
  0x2e   :  { %216 = vperm.xlu1 %1062, %v154_v23  }
  0x2f   :  { %211 = vperm.xlu0 %1061, %v153_v24  }
  0x32   :  { %114 = vperm.xlu1 %1062, %v44_v25  }
  0x33   :  { %109 = vperm.xlu0 %1061, %v43_v26  }
  0x36   :  { %226 = vperm.xlu1 %1062, %v156_v27  }
  0x37   :  { %221 = vperm.xlu0 %1061, %v155_v28  }
  0x3a   :  { %124 = vperm.xlu1 %1062, %v46_v29  }
  0x3b   :  { %119 = vperm.xlu0 %1061, %v45_v30  }
  0x3e   :  { %236 = vperm.xlu1 %1062, %v158_v31  }
  0x3f   :  { %231 = vperm.xlu0 %1061, %v157_v32  }
  0x42   :  { %406 = vperm.xlu1 %1062, %v384_v33  }
  0x43   :  { %401 = vperm.xlu0 %1061, %v383_v34  }
  0x46   :  { %416 = vperm.xlu1 %1062, %v386_v35  }
  0x47   :  { %411 = vperm.xlu0 %1061, %v385_v36  }
  0x4a   :  { %426 = vperm.xlu1 %1062, %v388_v37  }
  0x4b   :  { %421 = vperm.xlu0 %1061, %v387_v38  }
  0x4e   :  { %436 = vperm.xlu1 %1062, %v390_v39  }
  0x4f   :  { %431 = vperm.xlu0 %1061, %v389_v40  }
  0x52   :  { %446 = vperm.xlu1 %1062, %v392_v41  }
  0x53   :  { %441 = vperm.xlu0 %1061, %v391_v42  }
  0x56   :  { %456 = vperm.xlu1 %1062, %v394_v43  }
  0x57   :  { %451 = vperm.xlu0 %1061, %v393_v44  }
  0x5a   :  { %466 = vperm.xlu1 %1062, %v396_v45  }
  0x5b   :  { %461 = vperm.xlu0 %1061, %v395_v46  }
  0x5e   :  { %476 = vperm.xlu1 %1062, %v398_v47  }
  0x5f   :  { %471 = vperm.xlu0 %1061, %v397_v48  }
  0x63   :  { %740 = vperm.xlu0 %1061, %v737_v49  }
  0x81   :  { %v162_v55 = vpop.permute.xlu1 %161 }
  0x82   :  { %v50_v56 = vpop.permute.xlu0 %49 }
  0x83   :  { %v127_v57 = vmul.f32 %v50_v56, %v1405_v54 }
  0x85   :  { %v1408_v58 = vadd.f32 %v162_v55, %v127_v57  ;;  %v167_v59 = vpop.permute.xlu1 %166 }
  0x86   :  { %v55_v60 = vpop.permute.xlu0 %54 }
  0x87   :  { %v828_v61 = vmul.f32 -1.442695, %v1408_v58  ;;  %v128_v62 = vmul.f32 %v55_v60, %v1405_v54 }
  0x89   :  { %1063 = vpow2.f32 %v828_v61  ;;  %v240_v63 = vadd.f32 %v167_v59, %v128_v62  ;;  %v65_v0 = vpop.permute.xlu1 %64 }
  0x8a   :  { %v60_v1 = vpop.permute.xlu0 %59  ;;  %v130_v3 = vmul.f32 %v65_v0, %v1405_v54 }
  0x8b   :  { %v829_v2 = vmul.f32 -1.442695, %v240_v63  ;;  %v129_v4 = vmul.f32 %v60_v1, %v1405_v54 }
  0x8d   :  { %1065 = vpow2.f32 %v829_v2  ;;  %v177_v5 = vpop.permute.xlu1 %176 }
  0x8e   :  { %v172_v6 = vpop.permute.xlu0 %171  ;;  %v1414_v7 = vadd.f32 %v177_v5, %v130_v3 }
  0x8f   :  { %v1416_v8 = vadd.f32 %v172_v6, %v129_v4 }
  0x90   :  { %v831_v9 = vmul.f32 -1.442695, %v1414_v7 }
  0x91   :  { %v830_v10 = vmul.f32 -1.442695, %v1416_v8  ;;  %v75_v11 = vpop.permute.xlu1 %74 }
  0x92   :  { %v70_v12 = vpop.permute.xlu0 %69  ;;  %1067 = vpow2.f32 %v831_v9  ;;  %v132_v15 = vmul.f32 %v75_v11, %v1405_v54 }
  0x93   :  { %v1064_v13 = vpop.eup %1063  ;;  %1069 = vpow2.f32 %v830_v10  ;;  %v131_v16 = vmul.f32 %v70_v12, %v1405_v54 }
  0x94   :  { %v303_v14 = vadd.f32 1.0, %v1064_v13 }
  0x95   :  { %v187_v17 = vpop.permute.xlu1 %186 }
  0x96   :  { %v182_v18 = vpop.permute.xlu0 %181  ;;  %v1422_v20 = vadd.f32 %v187_v17, %v132_v15  ;;  %1071 = vrcp.f32 %v303_v14 }
  0x97   :  { %v1066_v19 = vpop.eup %1065  ;;  %v1424_v21 = vadd.f32 %v182_v18, %v131_v16 }
  0x98   :  { %v304_v22 = vadd.f32 1.0, %v1066_v19  ;;  %v833_v23 = vmul.f32 -1.442695, %v1422_v20 }
  0x99   :  { %v832_v24 = vmul.f32 -1.442695, %v1424_v21  ;;  %v85_v25 = vpop.permute.xlu1 %84 }
  0x9a   :  { %1073 = vrcp.f32 %v304_v22  ;;  %v80_v26 = vpop.permute.xlu0 %79  ;;  %v134_v28 = vmul.f32 %v85_v25, %v1405_v54 }
  0x9b   :  { %1075 = vpow2.f32 %v833_v23  ;;  %v133_v29 = vmul.f32 %v80_v26, %v1405_v54 }
  0x9c   :  { %1077 = vpow2.f32 %v832_v24  ;;  %v1068_v27 = vpop.eup %1067 }
  0x9d   :  { %v1070_v30 = vpop.eup %1069  ;;  %v306_v31 = vadd.f32 1.0, %v1068_v27  ;;  %v197_v32 = vpop.permute.xlu1 %196 }
  0x9e   :  { %v192_v33 = vpop.permute.xlu0 %191  ;;  %v305_v34 = vadd.f32 1.0, %v1070_v30  ;;  %v1430_v35 = vadd.f32 %v197_v32, %v134_v28 }
  0x9f   :  { %v1432_v36 = vadd.f32 %v192_v33, %v133_v29  ;;  %1079 = vrcp.f32 %v306_v31 }
  0xa0   :  { %1081 = vrcp.f32 %v305_v34  ;;  %v835_v37 = vmul.f32 -1.442695, %v1430_v35  ;;  %v1072_v39 = vpop.eup %1071 }
  0xa1   :  { %v834_v38 = vmul.f32 -1.442695, %v1432_v36  ;;  %v95_v40 = vpop.permute.xlu1 %94  ;;  %v351_v46 = vmul.f32 %v1072_v39, %v1408_v58 }
  0xa2   :  { %v90_v41 = vpop.permute.xlu0 %89  ;;  %1083 = vpow2.f32 %v835_v37  ;;  %v136_v44 = vmul.f32 %v95_v40, %v1405_v54 }
  0xa3   :  { %1085 = vpow2.f32 %v834_v38  ;;  %v135_v45 = vmul.f32 %v90_v41, %v1405_v54 }
  0xa4   :  { %v1074_v42 = vpop.eup %1073 }
  0xa5   :  { %v1076_v43 = vpop.eup %1075  ;;  %v352_v47 = vmul.f32 %v1074_v42, %v240_v63  ;;  %v207_v50 = vpop.permute.xlu1 %206 }
  0xa6   :  { %v1078_v48 = vpop.eup %1077  ;;  %v308_v49 = vadd.f32 1.0, %v1076_v43  ;;  %v202_v51 = vpop.permute.xlu0 %201  ;;  %v1439_v53 = vadd.f32 %v207_v50, %v136_v44 }
  0xa7   :  { %v307_v52 = vadd.f32 1.0, %v1078_v48  ;;  %v1441_v55 = vadd.f32 %v202_v51, %v135_v45  ;;  %v1000_v56 = vpack.c.bf16 %v352_v47, %v351_v46 }
  0xa8   :  { %1087 = vrcp.f32 %v308_v49  ;;  %v837_v57 = vmul.f32 -1.442695, %v1439_v53 }
  0xa9   :  { %1089 = vrcp.f32 %v307_v52  ;;  %v836_v59 = vmul.f32 -1.442695, %v1441_v55  ;;  %1001 = vmatprep.subr.bf16.mxu0 %v1000_v56  ;;  %v1080_v60 = vpop.eup %1079  ;;  %v105_v58 = vpop.permute.xlu1 %104 }
  0xaa   :  { %v100_v61 = vpop.permute.xlu0 %99  ;;  %1003 = vmatpush3.bf16.msra.mxu0 %v1000_v56  ;;  %v1082_v62 = vpop.eup %1081  ;;  %v354_v63 = vmul.f32 %v1080_v60, %v1414_v7  ;;  %1091 = vpow2.f32 %v837_v57  ;;  %v138_v2 = vmul.f32 %v105_v58, %v1405_v54 }
  0xab   :  { %v353_v0 = vmul.f32 %v1082_v62, %v1416_v8  ;;  %1093 = vpow2.f32 %v836_v59  ;;  %v137_v3 = vmul.f32 %v100_v61, %v1405_v54 }
  0xac   :  { %v1084_v1 = vpop.eup %1083 }
  0xad   :  { %v1086_v4 = vpop.eup %1085  ;;  %v310_v5 = vadd.f32 1.0, %v1084_v1  ;;  %v217_v6 = vpop.permute.xlu1 %216  ;;  %v1004_v10 = vpack.c.bf16 %v354_v63, %v353_v0 }
  0xae   :  { %v212_v9 = vpop.permute.xlu0 %211  ;;  %v309_v11 = vadd.f32 1.0, %v1086_v4  ;;  %v1449_v12 = vadd.f32 %v217_v6, %v138_v2 }
  0xaf   :  { %v1451_v13 = vadd.f32 %v212_v9, %v137_v3  ;;  %1095 = vrcp.f32 %v310_v5  ;;  %1005 = vmatprep.subr.bf16.mxu0 %v1004_v10 }
  0xb0   :  { %1097 = vrcp.f32 %v309_v11  ;;  %v839_v7 = vmul.f32 -1.442695, %v1449_v12  ;;  %1007 = vmatpush3.bf16.msra.mxu0 %v1004_v10 }
  0xb1   :  { %v838_v8 = vmul.f32 -1.442695, %v1451_v13  ;;  %v115_v15 = vpop.permute.xlu1 %114 }
  0xb2   :  { %v1088_v14 = vpop.eup %1087  ;;  %v110_v16 = vpop.permute.xlu0 %109  ;;  %1099 = vpow2.f32 %v839_v7  ;;  %v140_v23 = vmul.f32 %v115_v15, %v1405_v54 }
  0xb3   :  { %v1090_v17 = vpop.eup %1089  ;;  %v356_v18 = vmul.f32 %v1088_v14, %v1422_v20  ;;  %1101 = vpow2.f32 %v838_v8  ;;  %v139_v24 = vmul.f32 %v110_v16, %v1405_v54  ;;  %v368_v16 = vld [vmem:[%s1609_s2 + $0x8] sm:$0xff] }
  0xb4   :  { %v355_v19 = vmul.f32 %v1090_v17, %v1424_v21  ;;  %v1092_v22 = vpop.eup %1091  ;;  %v369_v17 = vld [vmem:[%s1609_s2 + $0x10] sm:$0xff] }
  0xb5   :  { %v1094_v25 = vpop.eup %1093  ;;  %v312_v26 = vadd.f32 1.0, %v1092_v22  ;;  %v227_v27 = vpop.permute.xlu1 %226  ;;  %v372_v22 = vld [vmem:[%s1609_s2 + $0x28] sm:$0xff] }
  0xb6   :  { %v222_v28 = vpop.permute.xlu0 %221  ;;  %v1008_v29 = vpack.c.bf16 %v356_v18, %v355_v19  ;;  %v311_v30 = vadd.f32 1.0, %v1094_v25  ;;  %v1459_v31 = vadd.f32 %v227_v27, %v140_v23  ;;  %v370_v18 = vld [vmem:[%s1609_s2 + $0x18] sm:$0xff]  ;;  %v371_v19 = vld [vmem:[%s1609_s2 + $0x20] sm:$0xff]  ;;  %v373_v23 = vld [vmem:[%s1609_s2 + $0x30] sm:$0xff] }
  0xb7   :  { %v1461_v32 = vadd.f32 %v222_v28, %v139_v24  ;;  %1103 = vrcp.f32 %v312_v26  ;;  %v374_v24 = vld [vmem:[%s1609_s2 + $0x38] sm:$0xff]  ;;  %v375_v25 = vld [vmem:[%s1609_s2 + $0x40] sm:$0xff]  ;;  %v376_v26 = vld [vmem:[%s1609_s2 + $0x48] sm:$0xff] }
  0xb8   :  { %1009 = vmatprep.subr.bf16.mxu0 %v1008_v29  ;;  %1105 = vrcp.f32 %v311_v30  ;;  %v841_v20 = vmul.f32 -1.442695, %v1459_v31  ;;  %v377_v27 = vld [vmem:[%s1609_s2 + $0x50] sm:$0xff]  ;;  %v378_v28 = vld [vmem:[%s1609_s2 + $0x58] sm:$0xff]  ;;  %v380_v30 = vld [vmem:[%s1609_s2 + $0x68] sm:$0xff] }
  0xb9   :  { %v840_v21 = vmul.f32 -1.442695, %v1461_v32  ;;  %1011 = vmatpush3.bf16.msra.mxu0 %v1008_v29  ;;  %v1096_v33 = vpop.eup %1095  ;;  %v125_v34 = vpop.permute.xlu1 %124  ;;  %v379_v29 = vld [vmem:[%s1609_s2 + $0x60] sm:$0xff] }
  0xba   :  { %v120_v37 = vpop.permute.xlu0 %119  ;;  %v1098_v38 = vpop.eup %1097  ;;  %v358_v39 = vmul.f32 %v1096_v33, %v1430_v35  ;;  %1107 = vpow2.f32 %v841_v20  ;;  %v142_v42 = vmul.f32 %v125_v34, %v1405_v54  ;;  %v1216_v20 = vmov 0.0|0.0  }
  0xbb   :  { %v357_v40 = vmul.f32 %v1098_v38, %v1432_v36  ;;  %1109 = vpow2.f32 %v840_v21  ;;  %v141_v43 = vmul.f32 %v120_v37, %v1405_v54  ;;  %1032 = vmatprep.subr.bf16.mxu1 %v1216_v20  ;;  %v1218_v21 = vmov 0.0  }
  0xbc   :  { %v1100_v41 = vpop.eup %1099  ;;  %997 = vmatprep.mubr.msk.f32.mxu1 %vm1217_vm0, %v1218_v21 }
  0xbd   :  { %v1102_v44 = vpop.eup %1101  ;;  %v314_v45 = vadd.f32 1.0, %v1100_v41  ;;  %v237_v46 = vpop.permute.xlu1 %236  ;;  %v1012_v48 = vpack.c.bf16 %v358_v39, %v357_v40 }
  0xbe   :  { %v232_v47 = vpop.permute.xlu0 %231  ;;  %v313_v49 = vadd.f32 1.0, %v1102_v44  ;;  %v254_v50 = vadd.f32 %v237_v46, %v142_v42 }
  0xbf   :  { %v253_v51 = vadd.f32 %v232_v47, %v141_v43  ;;  %1111 = vrcp.f32 %v314_v45  ;;  %1013 = vmatprep.subr.bf16.mxu0 %v1012_v48 }
  0xc0   :  { %1113 = vrcp.f32 %v313_v49  ;;  %v843_v35 = vmul.f32 -1.442695, %v254_v50  ;;  %1015 = vmatpush3.bf16.msra.mxu0 %v1012_v48 }
  0xc1   :  { %v842_v52 = vmul.f32 -1.442695, %v253_v51  ;;  %v1104_v36 = vpop.eup %1103  ;;  %v407_v33 = vpop.permute.xlu1 %406 }
  0xc2   :  { %v1106_v56 = vpop.eup %1105  ;;  %v360_v57 = vmul.f32 %v1104_v36, %v1439_v53  ;;  %1115 = vpow2.f32 %v843_v35  ;;  %v402_v34 = vpop.permute.xlu0 %401 }
  0xc3   :  { %v359_v54 = vmul.f32 %v1106_v56, %v1441_v55  ;;  %1117 = vpow2.f32 %v842_v52 }
  0xc4   :  { %v1108_v59 = vpop.eup %1107 }
  0xc5   :  { %v1110_v60 = vpop.eup %1109  ;;  %v316_v58 = vadd.f32 1.0, %v1108_v59  ;;  %v1016_v61 = vpack.c.bf16 %v360_v57, %v359_v54  ;;  %v417_v37 = vpop.permute.xlu1 %416 }
  0xc6   :  { %v315_v62 = vadd.f32 1.0, %v1110_v60  ;;  %v412_v38 = vpop.permute.xlu0 %411 }
  0xc7   :  { %1119 = vrcp.f32 %v316_v58  ;;  %1017 = vmatprep.subr.bf16.mxu0 %v1016_v61 }
  0xc8   :  { %1121 = vrcp.f32 %v315_v62  ;;  %1019 = vmatpush3.bf16.msra.mxu0 %v1016_v61 }
  0xc9   :  { %v1112_v63 = vpop.eup %1111  ;;  %v427_v39 = vpop.permute.xlu1 %426 }
  0xca   :  { %v1114_v0 = vpop.eup %1113  ;;  %v362_v1 = vmul.f32 %v1112_v63, %v1449_v12  ;;  %v422_v40 = vpop.permute.xlu0 %421 }
  0xcb   :  { %v361_v2 = vmul.f32 %v1114_v0, %v1451_v13 }
  0xcc   :  { %v1116_v53 = vpop.eup %1115 }
  0xcd   :  { %v1118_v3 = vpop.eup %1117  ;;  %v318_v4 = vadd.f32 1.0, %v1116_v53  ;;  %v1020_v55 = vpack.c.bf16 %v362_v1, %v361_v2  ;;  %v437_v46 = vpop.permute.xlu1 %436 }
  0xce   :  { %v317_v5 = vadd.f32 1.0, %v1118_v3  ;;  %v432_v49 = vpop.permute.xlu0 %431 }
  0xcf   :  { %1123 = vrcp.f32 %v318_v4  ;;  %1021 = vmatprep.subr.bf16.mxu0 %v1020_v55 }
  0xd0   :  { %1125 = vrcp.f32 %v317_v5  ;;  %1023 = vmatpush3.bf16.msra.mxu0 %v1020_v55 }
  0xd1   :  { %v1120_v6 = vpop.eup %1119  ;;  %v447_v59 = vpop.permute.xlu1 %446 }
  0xd2   :  { %v1122_v9 = vpop.eup %1121  ;;  %v364_v10 = vmul.f32 %v1120_v6, %v1459_v31  ;;  %v381_v31 = vld [vmem:[%s1609_s2 + $0x70] sm:$0xff]  ;;  %v442_v58 = vpop.permute.xlu0 %441 }
  0xd3   :  { %v363_v11 = vmul.f32 %v1122_v9, %v1461_v32  ;;  %v382_v32 = vld [vmem:[%s1609_s2 + $0x78] sm:$0xff] }
  0xd5   :  { %v1024_v7 = vpack.c.bf16 %v364_v10, %v363_v11  ;;  %v457_v55 = vpop.permute.xlu1 %456 }
  0xd6   :  { %v452_v10 = vpop.permute.xlu0 %451 }
  0xd7   :  { %1025 = vmatprep.subr.bf16.mxu0 %v1024_v7 }
  0xd8   :  { %1027 = vmatpush3.bf16.msra.mxu0 %v1024_v7 }
  0xd9   :  { %v1124_v12 = vpop.eup %1123 }
  0xda   :  { %v1126_v13 = vpop.eup %1125  ;;  %v366_v8 = vmul.f32 %v1124_v12, %v254_v50 }
  0xdb   :  { %v365_v14 = vmul.f32 %v1126_v13, %v253_v51 }
  0xdd   :  { %v1028_v15 = vpack.c.bf16 %v366_v8, %v365_v14 }
  0xdf   :  { %1029 = vmatprep.subr.bf16.mxu0 %v1028_v15 }
  0xe0   :  { %1031 = vmatpush3.bf16.msra.mxu0 %v1028_v15 }
  0xe3   :  { %942 = vmatmul.mubr.f32.vlgmr.msra.gmra.mrb[0].mxu0 %v368_v16 }
  0xe4   :  { %944 = vmatprep.mubr.f32.mxu0 %v369_v17 }
  0xe7   :  { %945 = vmatmul.mubr.f32.gmra.mrb[2].mxu0 %v370_v18 }
  0xe8   :  { %947 = vmatprep.mubr.f32.mxu0 %v371_v19 }
  0xeb   :  { %948 = vmatmul.mubr.f32.gmra.mrb[4].mxu0 %v372_v22 }
  0xec   :  { %950 = vmatprep.mubr.f32.mxu0 %v373_v23 }
  0xef   :  { %951 = vmatmul.mubr.f32.gmra.mrb[6].mxu0 %v374_v24  ;;  %v467_v24 = vpop.permute.xlu1 %466 }
  0xf0   :  { %953 = vmatprep.mubr.f32.mxu0 %v375_v25 }
  0xf3   :  { %954 = vmatmul.mubr.f32.gmra.mrb[8].mxu0 %v376_v26 }
  0xf4   :  { %956 = vmatprep.mubr.f32.mxu0 %v377_v27  ;;  %v462_v27 = vpop.permute.xlu0 %461 }
  0xf7   :  { %957 = vmatmul.mubr.f32.gmra.mrb[10].mxu0 %v378_v28 }
  0xf8   :  { %959 = vmatprep.mubr.f32.mxu0 %v379_v29 }
  0xfb   :  { %960 = vmatmul.mubr.f32.gmra.mrb[12].mxu0 %v380_v30 }
  0xfc   :  { %962 = vmatprep.mubr.f32.mxu0 %v381_v31 }
  0xff   :  { %963 = vmatmul.mubr.f32.gmra.mrb[14].mxu0 %v382_v32 }
 0x1b6   :  { %v943_v41 = vpop.f32.mrb[0].mxu0 }
 0x1b7   :  { %v1521_v42 = vadd.f32 %v943_v41, %v407_v33  ;;  %v545_v43 = vpop.f32.mrb[1].mxu0  ;;  %v477_v41 = vpop.permute.xlu1 %476 }
 0x1b8   :  { %v1523_v44 = vadd.f32 %v545_v43, %v402_v34 }
 0x1b9   :  { %v845_v45 = vmul.f32 -1.442695, %v1521_v42 }
 0x1ba   :  { %v844_v47 = vmul.f32 -1.442695, %v1523_v44  ;;  %v946_v48 = vpop.f32.mrb[2].mxu0 }
 0x1bb   :  { %1127 = vpow2.f32 %v845_v45  ;;  %v1527_v50 = vadd.f32 %v946_v48, %v417_v37  ;;  %v555_v51 = vpop.f32.mrb[3].mxu0  ;;  %v472_v48 = vpop.permute.xlu0 %471 }
 0x1bc   :  { %1129 = vpow2.f32 %v844_v47  ;;  %v1529_v35 = vadd.f32 %v555_v51, %v412_v38 }
 0x1bd   :  { %v847_v52 = vmul.f32 -1.442695, %v1527_v50 }
 0x1be   :  { %v846_v36 = vmul.f32 -1.442695, %v1529_v35  ;;  %v949_v56 = vpop.f32.mrb[4].mxu0 }
 0x1bf   :  { %1131 = vpow2.f32 %v847_v52  ;;  %v1533_v57 = vadd.f32 %v949_v56, %v427_v39  ;;  %v565_v54 = vpop.f32.mrb[5].mxu0 }
 0x1c0   :  { %1133 = vpow2.f32 %v846_v36  ;;  %v1535_v60 = vadd.f32 %v565_v54, %v422_v40 }
 0x1c1   :  { %v849_v61 = vmul.f32 -1.442695, %v1533_v57 }
 0x1c2   :  { %v848_v62 = vmul.f32 -1.442695, %v1535_v60  ;;  %v952_v63 = vpop.f32.mrb[6].mxu0 }
 0x1c3   :  { %1135 = vpow2.f32 %v849_v61  ;;  %v1539_v0 = vadd.f32 %v952_v63, %v437_v46  ;;  %v575_v1 = vpop.f32.mrb[7].mxu0 }
 0x1c4   :  { %1137 = vpow2.f32 %v848_v62  ;;  %v1541_v2 = vadd.f32 %v575_v1, %v432_v49 }
 0x1c5   :  { %v1128_v53 = vpop.eup %1127  ;;  %v851_v3 = vmul.f32 -1.442695, %v1539_v0 }
 0x1c6   :  { %v1130_v4 = vpop.eup %1129  ;;  %v673_v5 = vadd.f32 1.0, %v1128_v53  ;;  %v850_v6 = vmul.f32 -1.442695, %v1541_v2  ;;  %v955_v9 = vpop.f32.mrb[8].mxu0 }
 0x1c7   :  { %v672_v11 = vadd.f32 1.0, %v1130_v4  ;;  %1139 = vpow2.f32 %v851_v3  ;;  %v1545_v7 = vadd.f32 %v955_v9, %v447_v59  ;;  %v585_v12 = vpop.f32.mrb[9].mxu0 }
 0x1c8   :  { %1141 = vrcp.f32 %v673_v5  ;;  %v1547_v13 = vadd.f32 %v585_v12, %v442_v58 }
 0x1c9   :  { %v1132_v8 = vpop.eup %1131  ;;  %1143 = vrcp.f32 %v672_v11  ;;  %v853_v14 = vmul.f32 -1.442695, %v1545_v7 }
 0x1ca   :  { %v1134_v15 = vpop.eup %1133  ;;  %v675_v16 = vadd.f32 1.0, %v1132_v8  ;;  %1145 = vpow2.f32 %v850_v6  ;;  %v852_v17 = vmul.f32 -1.442695, %v1547_v13  ;;  %v958_v18 = vpop.f32.mrb[10].mxu0 }
 0x1cb   :  { %v674_v19 = vadd.f32 1.0, %v1134_v15  ;;  %1147 = vpow2.f32 %v853_v14  ;;  %v1551_v22 = vadd.f32 %v958_v18, %v457_v55  ;;  %v595_v23 = vpop.f32.mrb[11].mxu0 }
 0x1cc   :  { %1149 = vrcp.f32 %v675_v16  ;;  %v1553_v25 = vadd.f32 %v595_v23, %v452_v10 }
 0x1cd   :  { %v1136_v26 = vpop.eup %1135  ;;  %1151 = vrcp.f32 %v674_v19  ;;  %v855_v28 = vmul.f32 -1.442695, %v1551_v22 }
 0x1ce   :  { %v1138_v29 = vpop.eup %1137  ;;  %v677_v30 = vadd.f32 1.0, %v1136_v26  ;;  %1153 = vpow2.f32 %v852_v17  ;;  %v854_v31 = vmul.f32 -1.442695, %v1553_v25  ;;  %v961_v32 = vpop.f32.mrb[12].mxu0 }
 0x1cf   :  { %v676_v21 = vadd.f32 1.0, %v1138_v29  ;;  %1155 = vpow2.f32 %v855_v28  ;;  %v1557_v33 = vadd.f32 %v961_v32, %v467_v24  ;;  %v605_v34 = vpop.f32.mrb[13].mxu0 }
 0x1d0   :  { %1157 = vrcp.f32 %v677_v30  ;;  %v1559_v37 = vadd.f32 %v605_v34, %v462_v27 }
 0x1d1   :  { %v1140_v38 = vpop.eup %1139  ;;  %1159 = vrcp.f32 %v676_v21  ;;  %v857_v39 = vmul.f32 -1.442695, %v1557_v33 }
 0x1d2   :  { %v1142_v40 = vpop.eup %1141  ;;  %v679_v43 = vadd.f32 1.0, %v1140_v38  ;;  %1161 = vpow2.f32 %v854_v31  ;;  %v856_v45 = vmul.f32 -1.442695, %v1559_v37  ;;  %v964_v46 = vpop.f32.mrb[14].mxu0 }
 0x1d3   :  { %v1144_v47 = vpop.eup %1143  ;;  %v721_v49 = vmul.f32 %v1142_v40, %v1521_v42  ;;  %1163 = vpow2.f32 %v857_v39  ;;  %v1564_v51 = vadd.f32 %v964_v46, %v477_v41  ;;  %v615_v52 = vpop.f32.mrb[15].mxu0 }
 0x1d4   :  { %v1146_v36 = vpop.eup %1145  ;;  %v720_v56 = vmul.f32 %v1144_v47, %v1523_v44  ;;  %1165 = vrcp.f32 %v679_v43  ;;  %v1567_v54 = vadd.f32 %v615_v52, %v472_v48 }
 0x1d5   :  { %v1148_v59 = vpop.eup %1147  ;;  %v678_v58 = vadd.f32 1.0, %v1146_v36  ;;  %1167 = vpow2.f32 %v856_v45  ;;  %v859_v61 = vmul.f32 -1.442695, %v1564_v51 }
 0x1d6   :  { %v1150_v62 = vpop.eup %1149  ;;  %v681_v63 = vadd.f32 1.0, %v1148_v59  ;;  %v858_v1 = vmul.f32 -1.442695, %v1567_v54  ;;  %v1033_v42 = vpack.c.bf16 %v721_v49, %v720_v56 }
 0x1d7   :  { %v1152_v53 = vpop.eup %1151  ;;  %v723_v3 = vmul.f32 %v1150_v62, %v1527_v50  ;;  %1169 = vrcp.f32 %v678_v58 }
 0x1d8   :  { %v1154_v4 = vpop.eup %1153  ;;  %v722_v44 = vmul.f32 %v1152_v53, %v1529_v35  ;;  %1171 = vrcp.f32 %v681_v63  ;;  %1034 = vmatpush3.bf16.msra.mxu1 %v1033_v42 }
 0x1d9   :  { %v1156_v55 = vpop.eup %1155  ;;  %v680_v5 = vadd.f32 1.0, %v1154_v4  ;;  %1173 = vpow2.f32 %v859_v61  ;;  %1035 = vmatprep.subr.bf16.mxu1 %v1216_v20 }
 0x1da   :  { %v1158_v6 = vpop.eup %1157  ;;  %v683_v9 = vadd.f32 1.0, %v1156_v55  ;;  %1175 = vpow2.f32 %v858_v1  ;;  %v1036_v10 = vpack.c.bf16 %v723_v3, %v722_v44 }
 0x1db   :  { %v1160_v11 = vpop.eup %1159  ;;  %v725_v12 = vmul.f32 %v1158_v6, %v1533_v57  ;;  %1177 = vrcp.f32 %v680_v5 }
 0x1dc   :  { %v1162_v50 = vpop.eup %1161  ;;  %v724_v8 = vmul.f32 %v1160_v11, %v1535_v60  ;;  %1179 = vrcp.f32 %v683_v9  ;;  %1037 = vmatpush3.bf16.msra.mxu1 %v1036_v10 }
 0x1dd   :  { %v1164_v35 = vpop.eup %1163  ;;  %v682_v14 = vadd.f32 1.0, %v1162_v50  ;;  %1038 = vmatprep.subr.bf16.mxu1 %v1216_v20 }
 0x1de   :  { %v1166_v15 = vpop.eup %1165  ;;  %v685_v16 = vadd.f32 1.0, %v1164_v35  ;;  %v1039_v17 = vpack.c.bf16 %v725_v12, %v724_v8 }
 0x1df   :  { %v1168_v18 = vpop.eup %1167  ;;  %1181 = vrcp.f32 %v682_v14  ;;  %v727_v19 = vmul.f32 %v1166_v15, %v1539_v0 }
 0x1e0   :  { %1183 = vrcp.f32 %v685_v16  ;;  %v684_v23 = vadd.f32 1.0, %v1168_v18  ;;  %1040 = vmatpush3.bf16.msra.mxu1 %v1039_v17 }
 0x1e1   :  { %v1170_v57 = vpop.eup %1169  ;;  %1041 = vmatprep.subr.bf16.mxu1 %v1216_v20 }
 0x1e2   :  { %v1172_v60 = vpop.eup %1171  ;;  %v726_v24 = vmul.f32 %v1170_v57, %v1541_v2  ;;  %1185 = vrcp.f32 %v684_v23 }
 0x1e3   :  { %v1174_v26 = vpop.eup %1173  ;;  %v729_v28 = vmul.f32 %v1172_v60, %v1545_v7 }
 0x1e4   :  { %v1176_v27 = vpop.eup %1175  ;;  %v687_v29 = vadd.f32 1.0, %v1174_v26  ;;  %v1042_v30 = vpack.c.bf16 %v727_v19, %v726_v24 }
 0x1e5   :  { %v1178_v31 = vpop.eup %1177  ;;  %v686_v32 = vadd.f32 1.0, %v1176_v27 }
 0x1e6   :  { %v1180_v21 = vpop.eup %1179  ;;  %v728_v0 = vmul.f32 %v1178_v31, %v1547_v13  ;;  %1187 = vrcp.f32 %v687_v29  ;;  %1043 = vmatpush3.bf16.msra.mxu1 %v1042_v30 }
 0x1e7   :  { %1189 = vrcp.f32 %v686_v32  ;;  %1044 = vmatprep.subr.bf16.mxu1 %v1216_v20  ;;  %v731_v34 = vmul.f32 %v1180_v21, %v1551_v22 }
 0x1e8   :  { %v1045_v2 = vpack.c.bf16 %v729_v28, %v728_v0 }
 0x1e9   :  { %v1182_v38 = vpop.eup %1181 }
 0x1ea   :  { %v1184_v39 = vpop.eup %1183  ;;  %v730_v40 = vmul.f32 %v1182_v38, %v1553_v25  ;;  %1046 = vmatpush3.bf16.msra.mxu1 %v1045_v2 }
 0x1eb   :  { %v733_v7 = vmul.f32 %v1184_v39, %v1557_v33  ;;  %1047 = vmatprep.subr.bf16.mxu1 %v1216_v20  ;;  %v736_v33 = vld [vmem:[%s1611_s4] sm:$0xf] }
 0x1ec   :  { %v1186_v41 = vpop.eup %1185  ;;  %v1048_v43 = vpack.c.bf16 %v731_v34, %v730_v40 }
 0x1ed   :  { %v732_v13 = vmul.f32 %v1186_v41, %v1559_v37  ;;  %v741_v37 = vpop.permute.xlu0 %740 }
 0x1ee   :  { %1049 = vmatpush3.bf16.msra.mxu1 %v1048_v43 }
 0x1ef   :  { %1050 = vmatprep.subr.bf16.mxu1 %v1216_v20  ;;  %v1051_v45 = vpack.c.bf16 %v733_v7, %v732_v13 }
 0x1f0   :  { %v1188_v46 = vpop.eup %1187 }
 0x1f1   :  { %v1190_v22 = vpop.eup %1189  ;;  %v735_v47 = vmul.f32 %v1188_v46, %v1564_v51 }
 0x1f2   :  { %v734_v48 = vmul.f32 %v1190_v22, %v1567_v54  ;;  %1052 = vmatpush3.bf16.msra.mxu1 %v1051_v45 }
 0x1f3   :  { %1053 = vmatprep.subr.bf16.mxu1 %v1216_v20 }
 0x1f4   :  { %v1054_v25 = vpack.c.bf16 %v735_v47, %v734_v48 }
 0x1f6   :  { %1055 = vmatpush3.bf16.msra.mxu1 %v1054_v25 }
 0x1f9   :  { %998 = vmatmul.mubr.f32.vlgmr.msra.gmra.mrb[0].mxu1 %v736_v33 }
 0x2cc   :  { %v809_v49 = vpop.f32.mrb[0].mxu1 }
 0x2cd   :  { %v810_v52 = vadd.f32 %v809_v49, %v741_v37  ;;  %v999_v36 = vpop.f32.mrb[1].mxu1 }
 0x2cf   :  { %813 = vst [vmem:[#allocation2] sm:$0xf] %v810_v52 }
 0x2d0   :  { %1202 = shalt.err (!%p1199_p4)
}
 0x2d1   :  { %s1203_s4 = scalar_lea.hbm %s1613_s6, 64 }
 0x2d2   :  { %p1204_p5 = scmp.ne.s32.totalorder %s1613_s6, %s1203_s4  ;;  %p1207_p6 = scmp.lt.u32.totalorder %s1203_s4, %s1613_s6 }
 0x2d4   :  { %p1209_p7 = pnand %p1207_p6, %p1204_p5 }
 0x2d6   :  { %1212 = shalt.err (!%p1209_p7)
}
 0x2d7   :  { %823 = dma.vmem_to_hbm [thread:$0]  %s821_s23, 64, %s1613_s6, [#allocation3]  }
 0x2d8   :  { %1213 = dma.done.wait [#allocation3], 64  }
 0x2d9   :  { %1214 = vsyncadd [#allocation3], 4294967232 }
 0x2da   :  { %827 = vsyncpa [#allocation3], 1 }

</bundles_post_ra>
